<compile_context>
chip_gen: v7x
topology: tpu7x:2x2x1
jax: 0.10.0
libtpu: 0.0.40
codegen_flags: <defaults>
</compile_context>

<pallas_src>
import functools

import jax
import jax.numpy as jnp
from jax import lax
from jax.experimental import pallas as pl
from jax.experimental.pallas import tpu as pltpu


def _soft_argmin_kernel(x_ref, o_ref, *, d_chunk):
    """x_ref: (D, TH, W) block in VMEM (input dtype); o_ref: (TH, W) block."""
    D, TH, W = x_ref.shape
    f32 = jnp.float32

    def chunk_update(d0, dc, carry):
        # One online-softmin step over disparity rows [d0, d0 + dc).
        m, s, ws = carry
        xc = x_ref[pl.ds(d0, dc), :, :].astype(f32)       # per-chunk upcast only
        neg = -xc
        m_new = jnp.maximum(m, jnp.max(neg, axis=0))
        alpha = jnp.exp(m - m_new)                         # rescale old accumulators
        e = jnp.exp(neg - m_new[None, :, :])               # (dc, TH, W)
        d0f = jnp.asarray(d0, dtype=f32)
        s_c = e[0]
        ws_c = e[0] * d0f                                  # scalar splat per d-slice,
        for j in range(1, dc):                             # no D-sized iota tensor
            ej = e[j]
            s_c = s_c + ej
            ws_c = ws_c + ej * (d0f + f32(j))
        return m_new, alpha * s + s_c, alpha * ws + ws_c

    carry = (jnp.full((TH, W), -jnp.inf, dtype=f32),       # running max of -x
             jnp.zeros((TH, W), dtype=f32),                # running sum of exp
             jnp.zeros((TH, W), dtype=f32))                # running weighted sum

    dc = min(d_chunk, D)
    n_full = D // dc
    rem = D - n_full * dc

    if n_full > 1:
        def body(ci, carry):
            d0 = pl.multiple_of(ci * dc, dc)
            return chunk_update(d0, dc, carry)
        carry = lax.fori_loop(0, n_full, body, carry, unroll=True)
    elif n_full == 1:
        carry = chunk_update(0, dc, carry)
    if rem:
        carry = chunk_update(n_full * dc, rem, carry)      # static tail chunk

    _, s, ws = carry
    # Fused normalization: one reciprocal per output pixel on the EUP, plus one
    # Newton refinement step to recover f32-level accuracy (instead of D divides).
    inv = pl.reciprocal(s, approx=True)
    inv = inv * (2.0 - s * inv)
    o_ref[...] = (ws * inv).astype(o_ref.dtype)


def soft_argmin(x, *, d_chunk=8, block_vmem_budget_bytes=20 * 1024 * 1024):
    """Pallas soft-argmin: x [B, D, H, W] -> [B, 1, H, W] (same dtype as x)."""
    B, D, H, W = x.shape
    bpe = jnp.dtype(x.dtype).itemsize

    # Size the H tile from a VMEM budget: Pallas double-buffers both the
    # (D, TH, W) input block and the (TH, W) output block.
    per_row = 2 * D * W * bpe + 2 * W * bpe
    th = int((block_vmem_budget_bytes // max(per_row, 1)) // 8 * 8)
    th = max(th, 8)
    th = min(th, H)            # full extent if H fits (also covers H < 8)

    grid = (B, pl.cdiv(H, th))
    block_bytes = 2 * D * th * W * bpe + 2 * th * W * bpe
    vmem_limit = int(min(max(block_bytes + (4 << 20), 16 << 20), 48 << 20))

    kernel = functools.partial(_soft_argmin_kernel, d_chunk=d_chunk)
    cost = pl.CostEstimate(
        flops=6 * B * D * H * W,
        transcendentals=B * D * H * W,
        bytes_accessed=B * D * H * W * bpe + B * H * W * bpe,
    )

    return pl.pallas_call(
        kernel,
        out_shape=jax.ShapeDtypeStruct((B, 1, H, W), x.dtype),
        grid=grid,
        in_specs=[pl.BlockSpec((pl.Squeezed(), D, th, W),
                               lambda b, h: (b, 0, h, 0))],
        out_specs=pl.BlockSpec((pl.Squeezed(), pl.Squeezed(), th, W),
                               lambda b, h: (b, 0, h, 0)),
        compiler_params=pltpu.CompilerParams(
            dimension_semantics=("parallel", "parallel"),
            vmem_limit_bytes=vmem_limit,
        ),
        cost_estimate=cost,
    )(x)


def soft_argmin_ref(x):
    # Pure-JAX reference (matches torch: softmin over dim=1, weighted index sum).
    prob = jax.nn.softmax(-x.astype(jnp.float32), axis=1)
    idx = jnp.arange(x.shape[1], dtype=jnp.float32).reshape(1, -1, 1, 1)
    return jnp.sum(prob * idx, axis=1, keepdims=True).astype(x.dtype)


if __name__ == "__main__":
    key = jax.random.PRNGKey(0)
    k1, k2 = jax.random.split(key)

    # Case 1: D=16 exercises the unrolled fori_loop over D-chunks; H fits one tile.
    x1 = jax.random.normal(k1, (2, 16, 16, 128), dtype=jnp.float32)
    out1 = jax.block_until_ready(soft_argmin(x1))
    ref1 = jax.block_until_ready(soft_argmin_ref(x1))
    assert out1.shape == (2, 1, 16, 128), out1.shape
    assert jnp.allclose(out1, ref1, atol=1e-4, rtol=1e-4), "case 1 mismatch vs reference"

    # Case 2: tiny VMEM budget forces H tiling (TH=8, 3 H-tiles) and D=12 exercises
    # the ragged tail chunk of the online reduction.
    x2 = jax.random.normal(k2, (1, 12, 24, 256), dtype=jnp.float32)
    out2 = jax.block_until_ready(
        soft_argmin(x2, block_vmem_budget_bytes=256 * 1024))
    ref2 = jax.block_until_ready(soft_argmin_ref(x2))
    assert out2.shape == (1, 1, 24, 256), out2.shape
    assert jnp.allclose(out2, ref2, atol=1e-4, rtol=1e-4), "case 2 mismatch vs reference"

    print("KERNEL_OK")
</pallas_src>

<mosaic_0001>
module attributes {stable_mosaic.version = 11 : i64} {
  func.func @_soft_argmin_kernel(%arg0: i32, %arg1: i32, %arg2: memref<1x16x16x128xf32, #tpu.memory_space<vmem>>, %arg3: memref<1x1x16x128xf32, #tpu.memory_space<vmem>>) attributes {dimension_semantics = [#tpu.dimension_semantics<parallel>, #tpu.dimension_semantics<parallel>], iteration_bounds = array<i64: 2, 1>, scalar_prefetch = 0 : i64, scratch_operands = 0 : i64, tpu.core_type = #tpu.core_type<tc>, window_params = [{transform_indices = @transform_0, window_bounds = array<i64: 1, 16, 16, 128>}, {transform_indices = @transform_1, window_bounds = array<i64: 1, 1, 16, 128>}]} {
    %cst = arith.constant 0xFF800000 : f32
    %0 = vector.broadcast %cst : f32 to vector<16x128xf32>
    %cst_0 = arith.constant 0.000000e+00 : f32
    %1 = vector.broadcast %cst_0 : f32 to vector<16x128xf32>
    %cst_1 = arith.constant 0.000000e+00 : f32
    %2 = vector.broadcast %cst_1 : f32 to vector<16x128xf32>
    %c0_i32 = arith.constant 0 : i32
    %c8_i32 = arith.constant 8 : i32
    %3 = arith.muli %c0_i32, %c8_i32 : i32
    %4 = tpu.assume_multiple %3, 8 : i32
    %c0 = arith.constant 0 : index
    %5 = arith.index_cast %4 : i32 to index
    %c0_2 = arith.constant 0 : index
    %c0_3 = arith.constant 0 : index
    %6 = vector.load %arg2[%c0, %5, %c0_2, %c0_3] : memref<1x16x16x128xf32, #tpu.memory_space<vmem>>, vector<1x8x16x128xf32>
    %7 = vector.shape_cast %6 : vector<1x8x16x128xf32> to vector<8x16x128xf32>
    %cst_4 = arith.constant 0.000000e+00 : f32
    %8 = vector.broadcast %cst_4 : f32 to vector<8x16x128xf32>
    %9 = arith.subf %8, %7 : vector<8x16x128xf32>
    %cst_5 = arith.constant dense<0xFF800000> : vector<16x128xf32>
    %10 = vector.multi_reduction <maximumf>, %9, %cst_5 [0] : vector<8x16x128xf32> to vector<16x128xf32>
    %11 = arith.maximumf %0, %10 : vector<16x128xf32>
    %12 = arith.subf %0, %11 : vector<16x128xf32>
    %13 = math.exp %12 : vector<16x128xf32>
    %14 = vector.shape_cast %11 : vector<16x128xf32> to vector<1x16x128xf32>
    %15 = vector.broadcast %14 : vector<1x16x128xf32> to vector<8x16x128xf32>
    %16 = arith.subf %9, %15 : vector<8x16x128xf32>
    %17 = math.exp %16 : vector<8x16x128xf32>
    %18 = arith.sitofp %4 : i32 to f32
    %19 = vector.extract_strided_slice %17 {offsets = [0, 0, 0], sizes = [1, 16, 128], strides = [1, 1, 1]} : vector<8x16x128xf32> to vector<1x16x128xf32>
    %20 = vector.shape_cast %19 : vector<1x16x128xf32> to vector<16x128xf32>
    %21 = vector.extract_strided_slice %17 {offsets = [0, 0, 0], sizes = [1, 16, 128], strides = [1, 1, 1]} : vector<8x16x128xf32> to vector<1x16x128xf32>
    %22 = vector.shape_cast %21 : vector<1x16x128xf32> to vector<16x128xf32>
    %23 = vector.broadcast %18 : f32 to vector<16x128xf32>
    %24 = arith.mulf %22, %23 : vector<16x128xf32>
    %25 = vector.extract_strided_slice %17 {offsets = [1, 0, 0], sizes = [1, 16, 128], strides = [1, 1, 1]} : vector<8x16x128xf32> to vector<1x16x128xf32>
    %26 = vector.shape_cast %25 : vector<1x16x128xf32> to vector<16x128xf32>
    %27 = arith.addf %20, %26 : vector<16x128xf32>
    %cst_6 = arith.constant 1.000000e+00 : f32
    %28 = arith.addf %18, %cst_6 : f32
    %29 = vector.broadcast %28 : f32 to vector<16x128xf32>
    %30 = arith.mulf %26, %29 : vector<16x128xf32>
    %31 = arith.addf %24, %30 : vector<16x128xf32>
    %32 = vector.extract_strided_slice %17 {offsets = [2, 0, 0], sizes = [1, 16, 128], strides = [1, 1, 1]} : vector<8x16x128xf32> to vector<1x16x128xf32>
    %33 = vector.shape_cast %32 : vector<1x16x128xf32> to vector<16x128xf32>
    %34 = arith.addf %27, %33 : vector<16x128xf32>
    %cst_7 = arith.constant 2.000000e+00 : f32
    %35 = arith.addf %18, %cst_7 : f32
    %36 = vector.broadcast %35 : f32 to vector<16x128xf32>
    %37 = arith.mulf %33, %36 : vector<16x128xf32>
    %38 = arith.addf %31, %37 : vector<16x128xf32>
    %39 = vector.extract_strided_slice %17 {offsets = [3, 0, 0], sizes = [1, 16, 128], strides = [1, 1, 1]} : vector<8x16x128xf32> to vector<1x16x128xf32>
    %40 = vector.shape_cast %39 : vector<1x16x128xf32> to vector<16x128xf32>
    %41 = arith.addf %34, %40 : vector<16x128xf32>
    %cst_8 = arith.constant 3.000000e+00 : f32
    %42 = arith.addf %18, %cst_8 : f32
    %43 = vector.broadcast %42 : f32 to vector<16x128xf32>
    %44 = arith.mulf %40, %43 : vector<16x128xf32>
    %45 = arith.addf %38, %44 : vector<16x128xf32>
    %46 = vector.extract_strided_slice %17 {offsets = [4, 0, 0], sizes = [1, 16, 128], strides = [1, 1, 1]} : vector<8x16x128xf32> to vector<1x16x128xf32>
    %47 = vector.shape_cast %46 : vector<1x16x128xf32> to vector<16x128xf32>
    %48 = arith.addf %41, %47 : vector<16x128xf32>
    %cst_9 = arith.constant 4.000000e+00 : f32
    %49 = arith.addf %18, %cst_9 : f32
    %50 = vector.broadcast %49 : f32 to vector<16x128xf32>
    %51 = arith.mulf %47, %50 : vector<16x128xf32>
    %52 = arith.addf %45, %51 : vector<16x128xf32>
    %53 = vector.extract_strided_slice %17 {offsets = [5, 0, 0], sizes = [1, 16, 128], strides = [1, 1, 1]} : vector<8x16x128xf32> to vector<1x16x128xf32>
    %54 = vector.shape_cast %53 : vector<1x16x128xf32> to vector<16x128xf32>
    %55 = arith.addf %48, %54 : vector<16x128xf32>
    %cst_10 = arith.constant 5.000000e+00 : f32
    %56 = arith.addf %18, %cst_10 : f32
    %57 = vector.broadcast %56 : f32 to vector<16x128xf32>
    %58 = arith.mulf %54, %57 : vector<16x128xf32>
    %59 = arith.addf %52, %58 : vector<16x128xf32>
    %60 = vector.extract_strided_slice %17 {offsets = [6, 0, 0], sizes = [1, 16, 128], strides = [1, 1, 1]} : vector<8x16x128xf32> to vector<1x16x128xf32>
    %61 = vector.shape_cast %60 : vector<1x16x128xf32> to vector<16x128xf32>
    %62 = arith.addf %55, %61 : vector<16x128xf32>
    %cst_11 = arith.constant 6.000000e+00 : f32
    %63 = arith.addf %18, %cst_11 : f32
    %64 = vector.broadcast %63 : f32 to vector<16x128xf32>
    %65 = arith.mulf %61, %64 : vector<16x128xf32>
    %66 = arith.addf %59, %65 : vector<16x128xf32>
    %67 = vector.extract_strided_slice %17 {offsets = [7, 0, 0], sizes = [1, 16, 128], strides = [1, 1, 1]} : vector<8x16x128xf32> to vector<1x16x128xf32>
    %68 = vector.shape_cast %67 : vector<1x16x128xf32> to vector<16x128xf32>
    %69 = arith.addf %62, %68 : vector<16x128xf32>
    %cst_12 = arith.constant 7.000000e+00 : f32
    %70 = arith.addf %18, %cst_12 : f32
    %71 = vector.broadcast %70 : f32 to vector<16x128xf32>
    %72 = arith.mulf %68, %71 : vector<16x128xf32>
    %73 = arith.addf %66, %72 : vector<16x128xf32>
    %74 = arith.mulf %13, %1 : vector<16x128xf32>
    %75 = arith.addf %74, %69 : vector<16x128xf32>
    %76 = arith.mulf %13, %2 : vector<16x128xf32>
    %77 = arith.addf %76, %73 : vector<16x128xf32>
    %c1_i32 = arith.constant 1 : i32
    %c8_i32_13 = arith.constant 8 : i32
    %78 = arith.muli %c1_i32, %c8_i32_13 : i32
    %79 = tpu.assume_multiple %78, 8 : i32
    %c0_14 = arith.constant 0 : index
    %80 = arith.index_cast %79 : i32 to index
    %c0_15 = arith.constant 0 : index
    %c0_16 = arith.constant 0 : index
    %81 = vector.load %arg2[%c0_14, %80, %c0_15, %c0_16] : memref<1x16x16x128xf32, #tpu.memory_space<vmem>>, vector<1x8x16x128xf32>
    %82 = vector.shape_cast %81 : vector<1x8x16x128xf32> to vector<8x16x128xf32>
    %cst_17 = arith.constant 0.000000e+00 : f32
    %83 = vector.broadcast %cst_17 : f32 to vector<8x16x128xf32>
    %84 = arith.subf %83, %82 : vector<8x16x128xf32>
    %cst_18 = arith.constant dense<0xFF800000> : vector<16x128xf32>
    %85 = vector.multi_reduction <maximumf>, %84, %cst_18 [0] : vector<8x16x128xf32> to vector<16x128xf32>
    %86 = arith.maximumf %11, %85 : vector<16x128xf32>
    %87 = arith.subf %11, %86 : vector<16x128xf32>
    %88 = math.exp %87 : vector<16x128xf32>
    %89 = vector.shape_cast %86 : vector<16x128xf32> to vector<1x16x128xf32>
    %90 = vector.broadcast %89 : vector<1x16x128xf32> to vector<8x16x128xf32>
    %91 = arith.subf %84, %90 : vector<8x16x128xf32>
    %92 = math.exp %91 : vector<8x16x128xf32>
    %93 = arith.sitofp %79 : i32 to f32
    %94 = vector.extract_strided_slice %92 {offsets = [0, 0, 0], sizes = [1, 16, 128], strides = [1, 1, 1]} : vector<8x16x128xf32> to vector<1x16x128xf32>
    %95 = vector.shape_cast %94 : vector<1x16x128xf32> to vector<16x128xf32>
    %96 = vector.extract_strided_slice %92 {offsets = [0, 0, 0], sizes = [1, 16, 128], strides = [1, 1, 1]} : vector<8x16x128xf32> to vector<1x16x128xf32>
    %97 = vector.shape_cast %96 : vector<1x16x128xf32> to vector<16x128xf32>
    %98 = vector.broadcast %93 : f32 to vector<16x128xf32>
    %99 = arith.mulf %97, %98 : vector<16x128xf32>
    %100 = vector.extract_strided_slice %92 {offsets = [1, 0, 0], sizes = [1, 16, 128], strides = [1, 1, 1]} : vector<8x16x128xf32> to vector<1x16x128xf32>
    %101 = vector.shape_cast %100 : vector<1x16x128xf32> to vector<16x128xf32>
    %102 = arith.addf %95, %101 : vector<16x128xf32>
    %cst_19 = arith.constant 1.000000e+00 : f32
    %103 = arith.addf %93, %cst_19 : f32
    %104 = vector.broadcast %103 : f32 to vector<16x128xf32>
    %105 = arith.mulf %101, %104 : vector<16x128xf32>
    %106 = arith.addf %99, %105 : vector<16x128xf32>
    %107 = vector.extract_strided_slice %92 {offsets = [2, 0, 0], sizes = [1, 16, 128], strides = [1, 1, 1]} : vector<8x16x128xf32> to vector<1x16x128xf32>
    %108 = vector.shape_cast %107 : vector<1x16x128xf32> to vector<16x128xf32>
    %109 = arith.addf %102, %108 : vector<16x128xf32>
    %cst_20 = arith.constant 2.000000e+00 : f32
    %110 = arith.addf %93, %cst_20 : f32
    %111 = vector.broadcast %110 : f32 to vector<16x128xf32>
    %112 = arith.mulf %108, %111 : vector<16x128xf32>
    %113 = arith.addf %106, %112 : vector<16x128xf32>
    %114 = vector.extract_strided_slice %92 {offsets = [3, 0, 0], sizes = [1, 16, 128], strides = [1, 1, 1]} : vector<8x16x128xf32> to vector<1x16x128xf32>
    %115 = vector.shape_cast %114 : vector<1x16x128xf32> to vector<16x128xf32>
    %116 = arith.addf %109, %115 : vector<16x128xf32>
    %cst_21 = arith.constant 3.000000e+00 : f32
    %117 = arith.addf %93, %cst_21 : f32
    %118 = vector.broadcast %117 : f32 to vector<16x128xf32>
    %119 = arith.mulf %115, %118 : vector<16x128xf32>
    %120 = arith.addf %113, %119 : vector<16x128xf32>
    %121 = vector.extract_strided_slice %92 {offsets = [4, 0, 0], sizes = [1, 16, 128], strides = [1, 1, 1]} : vector<8x16x128xf32> to vector<1x16x128xf32>
    %122 = vector.shape_cast %121 : vector<1x16x128xf32> to vector<16x128xf32>
    %123 = arith.addf %116, %122 : vector<16x128xf32>
    %cst_22 = arith.constant 4.000000e+00 : f32
    %124 = arith.addf %93, %cst_22 : f32
    %125 = vector.broadcast %124 : f32 to vector<16x128xf32>
    %126 = arith.mulf %122, %125 : vector<16x128xf32>
    %127 = arith.addf %120, %126 : vector<16x128xf32>
    %128 = vector.extract_strided_slice %92 {offsets = [5, 0, 0], sizes = [1, 16, 128], strides = [1, 1, 1]} : vector<8x16x128xf32> to vector<1x16x128xf32>
    %129 = vector.shape_cast %128 : vector<1x16x128xf32> to vector<16x128xf32>
    %130 = arith.addf %123, %129 : vector<16x128xf32>
    %cst_23 = arith.constant 5.000000e+00 : f32
    %131 = arith.addf %93, %cst_23 : f32
    %132 = vector.broadcast %131 : f32 to vector<16x128xf32>
    %133 = arith.mulf %129, %132 : vector<16x128xf32>
    %134 = arith.addf %127, %133 : vector<16x128xf32>
    %135 = vector.extract_strided_slice %92 {offsets = [6, 0, 0], sizes = [1, 16, 128], strides = [1, 1, 1]} : vector<8x16x128xf32> to vector<1x16x128xf32>
    %136 = vector.shape_cast %135 : vector<1x16x128xf32> to vector<16x128xf32>
    %137 = arith.addf %130, %136 : vector<16x128xf32>
    %cst_24 = arith.constant 6.000000e+00 : f32
    %138 = arith.addf %93, %cst_24 : f32
    %139 = vector.broadcast %138 : f32 to vector<16x128xf32>
    %140 = arith.mulf %136, %139 : vector<16x128xf32>
    %141 = arith.addf %134, %140 : vector<16x128xf32>
    %142 = vector.extract_strided_slice %92 {offsets = [7, 0, 0], sizes = [1, 16, 128], strides = [1, 1, 1]} : vector<8x16x128xf32> to vector<1x16x128xf32>
    %143 = vector.shape_cast %142 : vector<1x16x128xf32> to vector<16x128xf32>
    %144 = arith.addf %137, %143 : vector<16x128xf32>
    %cst_25 = arith.constant 7.000000e+00 : f32
    %145 = arith.addf %93, %cst_25 : f32
    %146 = vector.broadcast %145 : f32 to vector<16x128xf32>
    %147 = arith.mulf %143, %146 : vector<16x128xf32>
    %148 = arith.addf %141, %147 : vector<16x128xf32>
    %149 = arith.mulf %88, %75 : vector<16x128xf32>
    %150 = arith.addf %149, %144 : vector<16x128xf32>
    %151 = arith.mulf %88, %77 : vector<16x128xf32>
    %152 = arith.addf %151, %148 : vector<16x128xf32>
    %c2_i32 = arith.constant 2 : i32
    %153 = tpu.reciprocal %150 {approx = true} : vector<16x128xf32> -> vector<16x128xf32>
    %154 = arith.mulf %150, %153 : vector<16x128xf32>
    %cst_26 = arith.constant 2.000000e+00 : f32
    %155 = vector.broadcast %cst_26 : f32 to vector<16x128xf32>
    %156 = arith.subf %155, %154 : vector<16x128xf32>
    %157 = arith.mulf %153, %156 : vector<16x128xf32>
    %158 = arith.mulf %152, %157 : vector<16x128xf32>
    %c0_27 = arith.constant 0 : index
    %c0_28 = arith.constant 0 : index
    %c0_29 = arith.constant 0 : index
    %c0_30 = arith.constant 0 : index
    %159 = vector.load %arg3[%c0_27, %c0_28, %c0_29, %c0_30] : memref<1x1x16x128xf32, #tpu.memory_space<vmem>>, vector<1x1x16x128xf32>
    %160 = vector.shape_cast %159 : vector<1x1x16x128xf32> to vector<16x128xf32>
    %161 = vector.shape_cast %158 : vector<16x128xf32> to vector<1x1x16x128xf32>
    tpu.vector_store %arg3[%c0_27, %c0_28, %c0_29, %c0_30], %161 {strides = array<i32>} : memref<1x1x16x128xf32, #tpu.memory_space<vmem>>, vector<1x1x16x128xf32>,
    return
  }
  func.func @transform_0(%arg0: i32, %arg1: i32) -> (i32, i32, i32, i32) {
    %c0_i32 = arith.constant 0 : i32
    %c0_i32_0 = arith.constant 0 : i32
    %c0_i32_1 = arith.constant 0 : i32
    return %arg0, %c0_i32, %arg1, %c0_i32_0 : i32, i32, i32, i32
  }
  func.func @transform_1(%arg0: i32, %arg1: i32) -> (i32, i32, i32, i32) {
    %c0_i32 = arith.constant 0 : i32
    %c0_i32_0 = arith.constant 0 : i32
    %c0_i32_1 = arith.constant 0 : i32
    return %arg0, %c0_i32, %arg1, %c0_i32_0 : i32, i32, i32, i32
  }
}

</mosaic_0001>

<bundles_post_ra>
// kernel: tpu_custom_call.1
= control target key start
LH: loop header
LB: loop body
LE: loop exit
PB: predicated region body
PF: predicated region fallthrough
CT: control target
= control target key end

     0   :  { %6 = vsyncpa [#allocation3], 0  ;;  %s1426_s0 = inlined_call_operand.hbm [shape: f32[2,16,16,128], index: 0, kind: input, shape index: {}]   ;;  %s1427_s1 = inlined_call_operand.hbm [shape: f32[2,1,16,128], index: 1, kind: output, shape index: {}]  }
   0x1   :  { %8 = vsyncpa [#allocation3 + $0x1], 0 }
   0x2   :  { %9 = vsyncpa [#allocation4], 0 }
   0x3   :  { %11 = vsyncpa [#allocation4 + $0x1], 0  ;;  %s916_s6 = smov 0   ;;  %s918_s7 = smov 0  }
   0x4   :  { %s920_s8 = smov 0   ;;  %s922_s9 = smov 0  }
   0x5   :  { %s924_s10 = smov 0   ;;  %s926_s11 = smov 0  }
   0x6 LB: > { %s611_s12 = sadd.s32 4294967295, %s898_s11   ;;  %s612_s13 = sadd.s32 4294967294, %s898_s11   ;;  %s898_s11 = sphi %s926_s11, %s17_s11   ;;  %s894_s10 = sphi %s924_s10, %s1458_s10   ;;  %s890_s9 = sphi %s922_s9, %s1457_s9   ;;  %s886_s8 = sphi %s920_s8, %s1456_s8   ;;  %s882_s7 = sphi %s918_s7, %s1455_s7   ;;  %s878_s6 = sphi %s916_s6, %s1454_s6  }
   0x7   : > { %s29_s14 = sadd.s32 1, %s894_s10  ;;  %s38_s15 = sadd.s32 1, %s886_s8 }
   0x8   : > { %p31_p0 = scmp.ge.s32.totalorder %s29_s14, 2  ;;  %p45_p1 = scmp.ne.s32.totalorder %s886_s8, %s882_s7 }
   0x9   : > { %p46_p2 = scmp.eq.s32.totalorder %s898_s11, 0  ;;  %p51_p3 = scmp.ne.s32.totalorder %s882_s7, %s878_s6 }
   0xa   : > { %s1460_s14 = smov (%p31_p0, %s29_s14), 0  ;;  %p52_p5 = scmp.eq.s32.totalorder %s611_s12, 0 }
   0xb   : > { %p957_p4 = por %p46_p2, %p45_p1  ;;  %s33_s17 = ssub.s32 %s894_s10, %s1460_s14 }
   0xc   : > { %p77_p6 = scmp.eq.s32.totalorder %s611_s12, 1  ;;  %p36_p7 = scmp.eq.s32.totalorder %s33_s17, 0 }
   0xd   : > { %p963_p8 = por %p52_p5, %p51_p3  ;;  %p83_p10 = scmp.eq.s32.totalorder %s612_s13, 1 }
   0xe   : > { %p967_p9 = por %p77_p6, %p45_p1  ;;  %p656_p13 = scmp.lt.s32.totalorder %s898_s11, 2 }
   0xf   : > { %s972_s20 = scalar_select %p36_p7, %s886_s8, %s38_s15  }
  0x10   : > { %s1439_s19 = scalar_select %p967_p9, 1, 0 }
  0x11   : > { %p974_p11 = por %p83_p10, %p51_p3  ;;  %s103_s22 = sand.u32 1, %s886_s8  }
  0x12   : > { %s615_s23 = sshll.u32 %s103_s22, 8  ;;  %s642_s24 = sshll.u32 %s894_s10, 12 }
  0x13   : > { %s1440_s21 = scalar_select %p974_p11, 1, 0 }
  0x14   : > { %s985_s27 = scalar_lea.hbm %s1426_s0, %s642_s24  ;;  %s107_s28 = scalar_lea.vmem [#allocation2], %s615_s23 }
  0x15   : > { %s116_s29 = sshll.u32 %s107_s28, 4  ;;  %p991_p0 = pnand %p656_p13, %p957_p4  ;;  %s987_s29 = int_to_ptr.vmem [resolvable:$true] %s116_s29 }
  0x16   : > { %s996_s2 = scalar_lea.sflag [#allocation3], %s103_s22  ;;  %s786_s3 = scalar_lea.hbm %s985_s27, 4096 }
  0x17   : > { %p787_p2 = scmp.ne.s32.totalorder %s985_s27, %s786_s3  ;;  %p788_p3 = pneg %p991_p0 }
  0x18   : > { %s791_s12 = scalar_lea.hbm %s1426_s0, 8192  ;;  %p792_p4 = scmp.lt.u32.totalorder %s985_s27, %s1426_s0 }
  0x19   : > { %p789_p5 = pnand %p788_p3, %p787_p2  ;;  %p793_p7 = scmp.lt.u32.totalorder %s791_s12, %s786_s3 }
  0x1a   : > { %p795_p13 = scmp.lt.u32.totalorder %s786_s3, %s985_s27 }
  0x1b   : > { %p790_p6 = pneg %p789_p5  ;;  %p794_p10 = por %p793_p7, %p792_p4 }
  0x1d   : > { %p796_p12 = por %p795_p13, %p794_p10 }
  0x1f   : > { %p797_p1 = pnand %p796_p12, %p790_p6 }
  0x21   : > { %800 = shalt.err (!%p797_p1)
}
  0x22   : > { %s801_s16 = scalar_lea.vmem %s987_s29, 4096  ;;  %s900_s17 = smov [#allocation2]  }
  0x23   : > { %p802_p2 = scmp.ne.s32.totalorder %s987_s29, %s801_s16  ;;  %s806_s22 = sshll.u32 %s900_s17, 4  ;;  %s807_s22 = int_to_ptr.vmem [resolvable:$false] %s806_s22 }
  0x24   : > { %s808_s23 = scalar_lea.vmem %s807_s22, 8192  ;;  %p809_p9 = scmp.lt.s32.totalorder %s987_s29, %s807_s22 }
  0x25   : > { %p804_p5 = pnand %p802_p2, %p788_p3  ;;  %p810_p4 = scmp.lt.s32.totalorder %s808_s23, %s801_s16 }
  0x27   : > { %p805_p11 = pneg %p804_p5  ;;  %p811_p7 = por %p810_p4, %p809_p9 }
  0x29   : > { %p812_p10 = pnand %p811_p7, %p805_p11 }
  0x2b   : > { %815 = shalt.err (!%p812_p10)
}
  0x2c   : > { %s901_s24 = smov 128   ;;  %s902_s25 = smov 8  }
  0x2d   : > { %651 = dma.hbm_to_vmem [thread:$0]  (!%p991_p0), %s985_s27, 4096, %s987_s29, %s996_s2, %s901_s24, %s901_s24, %s902_s25  }
  0x2e   : > { %p124_p12 = scmp.lt.s32.totalorder %s898_s11, 3  ;;  %p1442_p1 = scmp.ge.s32.totalorder %s898_s11, 1 }
  0x30   : > { %p125_p3 = pnand %p1442_p1, %p124_p12 }
  0x31   : > { %s1028_s26 = sand.u32 (!%p125_p3), 1, %s882_s7  }
  0x32   : > { %128 = sbr.rel (%p125_p3) target bundleno = 163 (0xa3), region = 24  ;;  %s619_s28 = sshll.u32 (!%p125_p3), %s1028_s26, 8 }
  0x33   : > { %s131_s3 = scalar_lea.sflag (!%p125_p3), [#allocation3], %s1028_s26  ;;  %s1032_s4 = scalar_lea.vmem (!%p125_p3), [#allocation2], %s619_s28 }
  0x39   : > { %869 = dma.done.wait (%p963_p8), %s131_s3, 4096  }
  0x3a   : > { %871 = vsyncadd (%p963_p8), %s131_s3, 4294963200  ;;  %v157_v0 = vld [vmem:[%s1032_s4] sm:$0xff]  ;;  %v1040_v1 = vld [vmem:[%s1032_s4 + $0x8] sm:$0xff]  ;;  %s620_s18 = sshll.u32 %s1028_s26, 4  ;;  %s643_s27 = sshll.u32 %s890_s9, 8 }
  0x3b   : > { %v159_v2 = vld [vmem:[%s1032_s4 + $0x10] sm:$0xff]  ;;  %v1044_v3 = vld [vmem:[%s1032_s4 + $0x18] sm:$0xff]  ;;  %v1047_v4 = vld [vmem:[%s1032_s4 + $0x20] sm:$0xff]  ;;  %v173_v6 = vsub.f32 0.0, %v157_v0  ;;  %v174_v7 = vsub.f32 0.0, %v1040_v1  ;;  %s152_s29 = scalar_lea.vmem [#allocation5], %s620_s18  ;;  %s1375_s12 = scalar_lea.hbm %s1427_s1, %s643_s27 }
  0x3c   : > { %v1050_v5 = vld [vmem:[%s1032_s4 + $0x28] sm:$0xff]  ;;  %v175_v8 = vsub.f32 0.0, %v159_v2  ;;  %v1054_v9 = vld [vmem:[%s1032_s4 + $0x30] sm:$0xff]  ;;  %v1057_v10 = vld [vmem:[%s1032_s4 + $0x38] sm:$0xff]  ;;  %v176_v12 = vsub.f32 0.0, %v1044_v3  ;;  %v177_v13 = vsub.f32 0.0, %v1047_v4 }
  0x3d   : > { %v1060_v11 = vld [vmem:[%s1032_s4 + $0x40] sm:$0xff]  ;;  %v178_v14 = vsub.f32 0.0, %v1050_v5  ;;  %v1066_v15 = vld [vmem:[%s1032_s4 + $0x48] sm:$0xff]  ;;  %v1069_v16 = vld [vmem:[%s1032_s4 + $0x50] sm:$0xff]  ;;  %v179_v18 = vsub.f32 0.0, %v1054_v9  ;;  %v180_v19 = vsub.f32 0.0, %v1057_v10 }
  0x3e   : > { %v1072_v17 = vld [vmem:[%s1032_s4 + $0x58] sm:$0xff]  ;;  %v181_v20 = vsub.f32 0.0, %v1060_v11  ;;  %v1078_v21 = vld [vmem:[%s1032_s4 + $0x60] sm:$0xff]  ;;  %v1081_v22 = vld [vmem:[%s1032_s4 + $0x70] sm:$0xff]  ;;  %v183_v23 = vsub.f32 0.0, %v1069_v16  ;;  %v189_v24 = vmax.f32 %v173_v6, %v177_v13  ;;  %v182_v26 = vsub.f32 0.0, %v1066_v15 }
  0x3f   : > { %v190_v25 = vmax.f32 %v175_v8, %v179_v18  ;;  %v184_v27 = vsub.f32 0.0, %v1072_v17  ;;  %v196_v28 = vmax.f32 %v174_v7, %v178_v14  ;;  %v197_v29 = vmax.f32 %v176_v12, %v180_v19  ;;  %v1095_v30 = vld [vmem:[%s1032_s4 + $0x68] sm:$0xff]  ;;  %v1098_v31 = vld [vmem:[%s1032_s4 + $0x78] sm:$0xff]  ;;  %v1123_v45 = vld [vmem:[%s1032_s4 + $0x80] sm:$0xff]  ;;  %s523_s30 = sshll.u32 %s152_s29, 4  ;;  %s508_s13 = scalar_lea.sflag [#allocation4], %s1028_s26  ;;  %s1377_s30 = int_to_ptr.vmem [resolvable:$true] %s523_s30 }
  0x40   : > { %v185_v32 = vsub.f32 0.0, %v1078_v21  ;;  %v187_v33 = vsub.f32 0.0, %v1081_v22  ;;  %v191_v34 = vmax.f32 %v189_v24, %v181_v20  ;;  %v186_v36 = vsub.f32 0.0, %v1095_v30  ;;  %v1126_v46 = vld [vmem:[%s1032_s4 + $0x88] sm:$0xff]  ;;  %v1129_v47 = vld [vmem:[%s1032_s4 + $0x90] sm:$0xff]  ;;  %v1132_v48 = vld [vmem:[%s1032_s4 + $0xa0] sm:$0xff] }
  0x41   : > { %v192_v35 = vmax.f32 %v190_v25, %v183_v23  ;;  %v188_v37 = vsub.f32 0.0, %v1098_v31  ;;  %v198_v38 = vmax.f32 %v196_v28, %v182_v26  ;;  %v199_v39 = vmax.f32 %v197_v29, %v184_v27  ;;  %v1135_v49 = vld [vmem:[%s1032_s4 + $0xb0] sm:$0xff]  ;;  %v1140_v51 = vld [vmem:[%s1032_s4 + $0x98] sm:$0xff]  ;;  %v1143_v52 = vld [vmem:[%s1032_s4 + $0xa8] sm:$0xff]  ;;  %s816_s9 = scalar_lea.vmem %s1377_s30, 256  ;;  %p1451_p9 = scmp.ne.s32.totalorder %s1439_s19, 0 }
  0x42   : > { %v193_v40 = vmax.f32 %v191_v34, %v185_v32  ;;  %v1146_v53 = vld [vmem:[%s1032_s4 + $0xb8] sm:$0xff]  ;;  %v1436_v55 = vsub.f32 0.0, %v1123_v45  ;;  %v1152_v57 = vld [vmem:[%s1032_s4 + $0xc0] sm:$0xff]  ;;  %v1155_v58 = vld [vmem:[%s1032_s4 + $0xd0] sm:$0xff]  ;;  %v1432_v59 = vsub.f32 0.0, %v1129_v47  ;;  %v1430_v60 = vsub.f32 0.0, %v1132_v48  ;;  %p817_p8 = scmp.ne.s32.totalorder %s1377_s30, %s816_s9 }
  0x43   : > { %v194_v41 = vmax.f32 %v192_v35, %v187_v33  ;;  %v200_v42 = vmax.f32 %v198_v38, %v186_v36  ;;  %v201_v43 = vmax.f32 %v199_v39, %v188_v37  ;;  %v1429_v61 = vsub.f32 0.0, %v1135_v49  ;;  %v1166_v3 = vld [vmem:[%s1032_s4 + $0xc8] sm:$0xff]  ;;  %v1179_v29 = vld [vmem:[%s1032_s4 + $0xf0] sm:$0xff]  ;;  %s903_s15 = smov [#allocation5]  }
  0x44   : > { %v1435_v62 = vsub.f32 0.0, %v1126_v46  ;;  %v1434_v63 = vsub.f32 0.0, %v1140_v51  ;;  %v1431_v0 = vsub.f32 0.0, %v1143_v52  ;;  %v1433_v1 = vsub.f32 0.0, %v1146_v53  ;;  %v1176_v28 = vld [vmem:[%s1032_s4 + $0xe8] sm:$0xff]  ;;  %p818_p11 = pnand %p817_p8, %p1451_p9  ;;  %s820_s16 = sshll.u32 %s903_s15, 4  ;;  %s821_s16 = int_to_ptr.vmem [resolvable:$false] %s820_s16 }
  0x45   : > { %v1120_v44 = vmax.f32 %v193_v40, %v194_v41  ;;  %v1137_v50 = vmax.f32 %v200_v42, %v201_v43  ;;  %v349_v34 = vsub.f32 0.0, %v1152_v57  ;;  %v351_v35 = vsub.f32 0.0, %v1155_v58  ;;  %v1205_v43 = vld [vmem:[%s1032_s4 + $0xf8] sm:$0xff]  ;;  %s822_s17 = scalar_lea.vmem %s821_s16, 512  ;;  %p823_p6 = scmp.lt.s32.totalorder %s1377_s30, %s821_s16 }
  0x46   : > { %v357_v39 = vmax.f32 %v1436_v55, %v1430_v60  ;;  %v350_v40 = vsub.f32 0.0, %v1166_v3  ;;  %v364_v4 = vmax.f32 %v1435_v62, %v1431_v0  ;;  %v356_v55 = vsub.f32 0.0, %v1205_v43  ;;  %p819_p0 = pneg %p818_p11  ;;  %p824_p13 = scmp.lt.s32.totalorder %s822_s17, %s816_s9 }
  0x47   : > { %v209_v54 = vsub.f32 %v173_v6, %v1120_v44  ;;  %v211_v56 = vsub.f32 %v175_v8, %v1120_v44  ;;  %v210_v2 = vsub.f32 %v174_v7, %v1137_v50  ;;  %v1169_v6 = vld [vmem:[%s1032_s4 + $0xd8] sm:$0xff]  ;;  %v1172_v8 = vld [vmem:[%s1032_s4 + $0xe0] sm:$0xff]  ;;  %v212_v24 = vsub.f32 %v176_v12, %v1137_v50 }
  0x48   : > { %v213_v7 = vsub.f32 %v177_v13, %v1120_v44  ;;  %v358_v12 = vmax.f32 %v1432_v59, %v1429_v61  ;;  %v352_v41 = vsub.f32 0.0, %v1169_v6  ;;  %v365_v13 = vmax.f32 %v1434_v63, %v1433_v1  ;;  %p825_p2 = por %p824_p13, %p823_p6 }
  0x49   : > { %v225_v25 = vmul.f32 1.442695, %v209_v54  ;;  %v229_v38 = vmul.f32 1.442695, %v211_v56  ;;  %v227_v42 = vmul.f32 1.442695, %v210_v2  ;;  %v214_v60 = vsub.f32 %v178_v14, %v1137_v50 }
  0x4a   : > { %v353_v54 = vsub.f32 0.0, %v1172_v8  ;;  %v354_v56 = vsub.f32 0.0, %v1176_v28  ;;  %v355_v61 = vsub.f32 0.0, %v1179_v29  ;;  %v215_v0 = vsub.f32 %v179_v18, %v1120_v44  ;;  %p826_p5 = pnand %p825_p2, %p819_p0 }
  0x4b   : > { %710 = vpow2.f32 %v225_v25  ;;  %v231_v59 = vmul.f32 1.442695, %v212_v24  ;;  %v233_v2 = vmul.f32 1.442695, %v213_v7  ;;  %v359_v1 = vmax.f32 %v357_v39, %v349_v34 }
  0x4c   : > { %712 = vpow2.f32 %v229_v38  ;;  %v360_v63 = vmax.f32 %v358_v12, %v351_v35  ;;  %v203_v62 = vsub.f32 -inf, %v1120_v44  ;;  %v366_v5 = vmax.f32 %v364_v4, %v350_v40 }
  0x4d   : > { %v367_v9 = vmax.f32 %v365_v13, %v352_v41  ;;  %v204_v14 = vsub.f32 -inf, %v1137_v50  ;;  %714 = vpow2.f32 %v227_v42  ;;  %v216_v18 = vsub.f32 %v180_v19, %v1137_v50 }
  0x4e   : > { %v217_v24 = vsub.f32 %v181_v20, %v1120_v44  ;;  %716 = vpow2.f32 %v231_v59  ;;  %v235_v25 = vmul.f32 1.442695, %v214_v60  ;;  %v237_v7 = vmul.f32 1.442695, %v215_v0 }
  0x4f   : > { %718 = vpow2.f32 %v233_v2  ;;  %v361_v38 = vmax.f32 %v359_v1, %v353_v54  ;;  %v362_v39 = vmax.f32 %v360_v63, %v355_v61  ;;  %v205_v12 = vmul.f32 1.442695, %v203_v62 }
  0x50   : > { %v218_v10 = vsub.f32 %v182_v26, %v1137_v50  ;;  %v368_v19 = vmax.f32 %v366_v5, %v354_v56  ;;  %v369_v11 = vmax.f32 %v367_v9, %v356_v55  ;;  %v207_v20 = vmul.f32 1.442695, %v204_v14 }
  0x51   : > { %v219_v59 = vsub.f32 %v183_v23, %v1120_v44  ;;  %v220_v60 = vsub.f32 %v184_v27, %v1137_v50  ;;  %720 = vpow2.f32 %v235_v25  ;;  %v239_v62 = vmul.f32 1.442695, %v216_v18 }
  0x52   : > { %v221_v15 = vsub.f32 %v185_v32, %v1120_v44  ;;  %722 = vpow2.f32 %v237_v7  ;;  %v241_v26 = vmul.f32 1.442695, %v217_v24  ;;  %v363_v63 = vmax.f32 %v361_v38, %v362_v39 }
  0x53   : > { %724 = vpow2.f32 %v205_v12  ;;  %v222_v16 = vsub.f32 %v186_v36, %v1137_v50  ;;  %v243_v23 = vmul.f32 1.442695, %v218_v10  ;;  %v370_v1 = vmax.f32 %v368_v19, %v369_v11 }
  0x54   : > { %726 = vpow2.f32 %v207_v20  ;;  %v245_v17 = vmul.f32 1.442695, %v219_v59  ;;  %v223_v27 = vsub.f32 %v187_v33, %v1120_v44  ;;  %v247_v21 = vmul.f32 1.442695, %v220_v60 }
  0x55   : > { %v711_v0 = vpop.eup %710  ;;  %728 = vpow2.f32 %v239_v62  ;;  %v224_v13 = vsub.f32 %v188_v37, %v1137_v50  ;;  %v249_v42 = vmul.f32 1.442695, %v221_v15  ;;  %v1263_v30 = vmax.f32 %v1120_v44, %v363_v63 }
  0x56   : > { %v713_v4 = vpop.eup %712  ;;  %730 = vpow2.f32 %v241_v26  ;;  %v251_v2 = vmul.f32 1.442695, %v222_v16  ;;  %v1266_v9 = vmax.f32 %v1137_v50, %v370_v1  ;;  %v259_v33 = vmul.f32 0.0, %v711_v0 }
  0x57   : > { %v715_v32 = vpop.eup %714  ;;  %732 = vpow2.f32 %v243_v23  ;;  %v261_v5 = vadd.f32 %v713_v4, %v711_v0  ;;  %v373_v14 = vsub.f32 %v1120_v44, %v1263_v30  ;;  %v253_v31 = vmul.f32 1.442695, %v223_v27 }
  0x58   : > { %v717_v36 = vpop.eup %716  ;;  %734 = vpow2.f32 %v245_v17  ;;  %v374_v37 = vsub.f32 %v1137_v50, %v1266_v9  ;;  %v255_v18 = vmul.f32 1.442695, %v224_v13  ;;  %v260_v24 = vmul.f32 0.0, %v715_v32 }
  0x59   : > { %v719_v22 = vpop.eup %718  ;;  %736 = vpow2.f32 %v247_v21  ;;  %v262_v25 = vadd.f32 %v717_v36, %v715_v32  ;;  %v267_v12 = vadd.f32 %v713_v4, %v259_v33  ;;  %v375_v10 = vmul.f32 1.442695, %v373_v14 }
  0x5a   : > { %738 = vpow2.f32 %v249_v42  ;;  %v269_v38 = vadd.f32 %v719_v22, %v261_v5  ;;  %v1443_v19 = vsub.f32 0.0, %v1123_v45  ;;  %v1444_v44 = vsub.f32 0.0, %v1126_v46 }
  0x5b   : > { %v721_v7 = vpop.eup %720  ;;  %740 = vpow2.f32 %v251_v2  ;;  %v377_v50 = vmul.f32 1.442695, %v374_v37  ;;  %v1445_v60 = vsub.f32 0.0, %v1129_v47  ;;  %v1446_v15 = vsub.f32 0.0, %v1140_v51 }
  0x5c   : > { %v723_v39 = vpop.eup %722  ;;  %v379_v11 = vsub.f32 %v1443_v19, %v1263_v30  ;;  %v380_v20 = vsub.f32 %v1444_v44, %v1266_v9  ;;  %742 = vpow2.f32 %v253_v31  ;;  %v268_v45 = vadd.f32 %v717_v36, %v260_v24 }
  0x5d   : > { %v1278_v59 = vpop.eup %724  ;;  %v381_v62 = vsub.f32 %v1445_v60, %v1263_v30  ;;  %v382_v26 = vsub.f32 %v1446_v15, %v1266_v9  ;;  %744 = vpow2.f32 %v255_v18  ;;  %v270_v0 = vadd.f32 %v721_v7, %v262_v25 }
  0x5e   : > { %v1286_v63 = vpop.eup %726  ;;  %v1447_v46 = vsub.f32 0.0, %v1132_v48  ;;  %v273_v1 = vmul.f32 2.0, %v719_v22  ;;  %v274_v4 = vmul.f32 2.0, %v721_v7  ;;  %v277_v17 = vadd.f32 %v723_v39, %v269_v38 }
  0x5f   : > { %v729_v23 = vpop.eup %728  ;;  %v1448_v47 = vsub.f32 0.0, %v1143_v52  ;;  %746 = vpow2.f32 %v375_v10  ;;  %v1449_v51 = vsub.f32 0.0, %v1135_v49  ;;  %v395_v13 = vmul.f32 1.442695, %v379_v11 }
  0x60   : > { %v383_v16 = vsub.f32 %v1447_v46, %v1263_v30  ;;  %v731_v21 = vpop.eup %730  ;;  %v397_v42 = vmul.f32 1.442695, %v380_v20  ;;  %748 = vpow2.f32 %v377_v50  ;;  %v1450_v48 = vsub.f32 0.0, %v1146_v53 }
  0x61   : > { %v384_v27 = vsub.f32 %v1448_v47, %v1266_v9  ;;  %v385_v32 = vsub.f32 %v1449_v51, %v1263_v30  ;;  %v1297_v36 = vpop.eup %732  ;;  %v399_v5 = vmul.f32 1.442695, %v381_v62  ;;  %v401_v22 = vmul.f32 1.442695, %v382_v26 }
  0x62   : > { %v386_v2 = vsub.f32 %v1450_v48, %v1266_v9  ;;  %v1302_v33 = vpop.eup %734  ;;  %v278_v52 = vadd.f32 %v729_v23, %v270_v0  ;;  %v387_v14 = vsub.f32 %v349_v34, %v1263_v30  ;;  %750 = vpow2.f32 %v395_v13 }
  0x63   : > { %v403_v49 = vmul.f32 1.442695, %v383_v16  ;;  %v1307_v31 = vpop.eup %736  ;;  %v275_v37 = vadd.f32 %v273_v1, %v267_v12  ;;  %v388_v18 = vsub.f32 %v350_v40, %v1266_v9  ;;  %752 = vpow2.f32 %v397_v42 }
  0x64   : > { %v405_v53 = vmul.f32 1.442695, %v384_v27  ;;  %v1312_v24 = vpop.eup %738  ;;  %v285_v25 = vadd.f32 %v731_v21, %v277_v17  ;;  %v389_v7 = vsub.f32 %v351_v35, %v1263_v30  ;;  %754 = vpow2.f32 %v399_v5 }
  0x65   : > { %v407_v57 = vmul.f32 1.442695, %v385_v32  ;;  %v1317_v34 = vpop.eup %740  ;;  %v281_v38 = vmul.f32 3.0, %v723_v39  ;;  %v390_v12 = vsub.f32 %v352_v41, %v1266_v9  ;;  %756 = vpow2.f32 %v401_v22 }
  0x66   : > { %v409_v3 = vmul.f32 1.442695, %v386_v2  ;;  %v286_v40 = vadd.f32 %v1297_v36, %v278_v52  ;;  %v391_v10 = vsub.f32 %v353_v54, %v1263_v30  ;;  %758 = vpow2.f32 %v403_v49  ;;  %v1326_v35 = vpop.eup %742 }
  0x67   : > { %v411_v58 = vmul.f32 1.442695, %v387_v14  ;;  %v276_v19 = vadd.f32 %v274_v4, %v268_v45  ;;  %v392_v39 = vsub.f32 %v354_v56, %v1266_v9  ;;  %760 = vpow2.f32 %v405_v53  ;;  %v1331_v41 = vpop.eup %744 }
  0x68   : > { %v413_v6 = vmul.f32 1.442695, %v388_v18  ;;  %v293_v11 = vadd.f32 %v1302_v33, %v285_v25  ;;  %v393_v8 = vsub.f32 %v355_v61, %v1263_v30  ;;  %762 = vpow2.f32 %v407_v57 }
  0x69   : > { %v415_v54 = vmul.f32 1.442695, %v389_v7  ;;  %v282_v44 = vmul.f32 3.0, %v729_v23  ;;  %v394_v20 = vsub.f32 %v356_v55, %v1266_v9  ;;  %764 = vpow2.f32 %v409_v3  ;;  %v1340_v56 = vpop.eup %746 }
  0x6a   : > { %v417_v28 = vmul.f32 1.442695, %v390_v12  ;;  %v294_v50 = vadd.f32 %v1307_v31, %v286_v40  ;;  %v1344_v60 = vmul.f32 0.0, %v1278_v59  ;;  %766 = vpow2.f32 %v411_v58  ;;  %v1346_v29 = vpop.eup %748 }
  0x6b   : > { %v419_v62 = vmul.f32 1.442695, %v391_v10  ;;  %v283_v61 = vadd.f32 %v281_v38, %v275_v37  ;;  %v289_v30 = vmul.f32 4.0, %v731_v21  ;;  %768 = vpow2.f32 %v413_v6 }
  0x6c   : > { %v421_v15 = vmul.f32 1.442695, %v392_v39  ;;  %v751_v26 = vpop.eup %750  ;;  %v301_v55 = vadd.f32 %v1312_v24, %v293_v11  ;;  %v1350_v43 = vmul.f32 0.0, %v1286_v63  ;;  %770 = vpow2.f32 %v415_v54 }
  0x6d   : > { %v423_v9 = vmul.f32 1.442695, %v393_v8  ;;  %v753_v45 = vpop.eup %752  ;;  %v284_v0 = vadd.f32 %v282_v44, %v276_v19  ;;  %772 = vpow2.f32 %v417_v28  ;;  %v425_v59 = vmul.f32 1.442695, %v394_v20 }
  0x6e   : > { %v429_v46 = vmul.f32 8.0, %v751_v26  ;;  %v755_v16 = vpop.eup %754  ;;  %v290_v23 = vmul.f32 4.0, %v1297_v36  ;;  %v302_v1 = vadd.f32 %v1317_v34, %v294_v50  ;;  %774 = vpow2.f32 %v419_v62 }
  0x6f   : > { %v430_v4 = vmul.f32 8.0, %v753_v45  ;;  %v757_v17 = vpop.eup %756  ;;  %v291_v47 = vadd.f32 %v289_v30, %v283_v61  ;;  %776 = vpow2.f32 %v421_v15  ;;  %v431_v27 = vadd.f32 %v755_v16, %v751_v26 }
  0x70   : > { %v435_v63 = vmul.f32 9.0, %v755_v16  ;;  %v759_v21 = vpop.eup %758  ;;  %v309_v51 = vadd.f32 %v1326_v35, %v301_v55  ;;  %778 = vpow2.f32 %v423_v9  ;;  %v432_v32 = vadd.f32 %v757_v17, %v753_v45 }
  0x71   : > { %v436_v13 = vmul.f32 9.0, %v757_v17  ;;  %v761_v42 = vpop.eup %760  ;;  %780 = vpow2.f32 %v425_v59  ;;  %v439_v2 = vadd.f32 %v759_v21, %v431_v27  ;;  %v443_v36 = vmul.f32 10.0, %v759_v21 }
  0x72   : > { %v437_v48 = vadd.f32 %v435_v63, %v429_v46  ;;  %v763_v5 = vpop.eup %762  ;;  %v310_v22 = vadd.f32 %v1331_v41, %v302_v1  ;;  %v440_v14 = vadd.f32 %v761_v42, %v432_v32  ;;  %v444_v49 = vmul.f32 10.0, %v761_v42 }
  0x73   : > { %v438_v52 = vadd.f32 %v436_v13, %v430_v4  ;;  %v765_v37 = vpop.eup %764  ;;  %v292_v18 = vadd.f32 %v290_v23, %v284_v0  ;;  %v297_v53 = vmul.f32 5.0, %v1302_v33  ;;  %v298_v25 = vmul.f32 5.0, %v1307_v31 }
  0x74   : > { %v447_v7 = vadd.f32 %v763_v5, %v439_v2  ;;  %v767_v57 = vpop.eup %766  ;;  %v445_v38 = vadd.f32 %v443_v36, %v437_v48  ;;  %v448_v12 = vadd.f32 %v765_v37, %v440_v14  ;;  %v451_v3 = vmul.f32 11.0, %v763_v5 }
  0x75   : > { %v769_v40 = vpop.eup %768  ;;  %v319_v10 = vadd.f32 %v1344_v60, %v309_v51  ;;  %v446_v58 = vadd.f32 %v444_v49, %v438_v52  ;;  %v452_v19 = vmul.f32 11.0, %v765_v37  ;;  %v320_v11 = vadd.f32 %v1350_v43, %v310_v22 }
  0x76   : > { %v455_v39 = vadd.f32 %v767_v57, %v447_v7  ;;  %v771_v6 = vpop.eup %770  ;;  %v456_v8 = vadd.f32 %v769_v40, %v448_v12  ;;  %v299_v44 = vadd.f32 %v297_v53, %v291_v47  ;;  %v300_v33 = vadd.f32 %v298_v25, %v292_v18 }
  0x77   : > { %v773_v54 = vpop.eup %772  ;;  %v305_v31 = vmul.f32 6.0, %v1312_v24  ;;  %v306_v50 = vmul.f32 6.0, %v1317_v34  ;;  %v453_v62 = vadd.f32 %v451_v3, %v445_v38  ;;  %v459_v61 = vmul.f32 12.0, %v767_v57 }
  0x78   : > { %v463_v20 = vadd.f32 %v771_v6, %v455_v39  ;;  %v775_v28 = vpop.eup %774  ;;  %v464_v30 = vadd.f32 %v773_v54, %v456_v8  ;;  %v454_v26 = vadd.f32 %v452_v19, %v446_v58  ;;  %v460_v55 = vmul.f32 12.0, %v769_v40 }
  0x79   : > { %v777_v15 = vpop.eup %776  ;;  %v487_v45 = vmul.f32 %v1340_v56, %v319_v10  ;;  %v488_v46 = vmul.f32 %v1346_v29, %v320_v11  ;;  %v307_v23 = vadd.f32 %v305_v31, %v299_v44  ;;  %v313_v24 = vmul.f32 7.0, %v1326_v35 }
  0x7a   : > { %v471_v9 = vadd.f32 %v775_v28, %v463_v20  ;;  %v779_v0 = vpop.eup %778  ;;  %v472_v59 = vadd.f32 %v777_v15, %v464_v30  ;;  %v308_v4 = vadd.f32 %v306_v50, %v300_v33  ;;  %v461_v34 = vadd.f32 %v459_v61, %v453_v62 }
  0x7b   : > { %v781_v16 = vpop.eup %780  ;;  %v467_v17 = vmul.f32 13.0, %v771_v6  ;;  %v314_v27 = vmul.f32 7.0, %v1331_v41  ;;  %v462_v63 = vadd.f32 %v460_v55, %v454_v26  ;;  %v468_v21 = vmul.f32 13.0, %v773_v54 }
  0x7c   : > { %v479_v1 = vadd.f32 %v779_v0, %v471_v9  ;;  %v480_v47 = vadd.f32 %v781_v16, %v472_v59  ;;  %v315_v13 = vadd.f32 %v313_v24, %v307_v23  ;;  %v475_v48 = vmul.f32 14.0, %v775_v28 }
  0x7d   : > { %v469_v42 = vadd.f32 %v467_v17, %v461_v34  ;;  %v316_v2 = vadd.f32 %v314_v27, %v308_v4  ;;  %v470_v36 = vadd.f32 %v468_v21, %v462_v63  ;;  %v476_v35 = vmul.f32 14.0, %v777_v15 }
  0x7e   : > { %v489_v51 = vadd.f32 %v487_v45, %v479_v1  ;;  %v490_v32 = vadd.f32 %v488_v46, %v480_v47  ;;  %v321_v5 = vadd.f32 %v1344_v60, %v315_v13  ;;  %v483_v52 = vmul.f32 15.0, %v779_v0 }
  0x7f   : > { %v477_v22 = vadd.f32 %v475_v48, %v469_v42  ;;  %v322_v14 = vadd.f32 %v1350_v43, %v316_v2  ;;  %v478_v41 = vadd.f32 %v476_v35, %v470_v36  ;;  %v484_v49 = vmul.f32 15.0, %v781_v16 }
  0x80   : > { %782 = vrcp.f32 %v489_v51  ;;  %v491_v18 = vmul.f32 %v1340_v56, %v321_v5 }
  0x81   : > { %784 = vrcp.f32 %v490_v32  ;;  %v485_v37 = vadd.f32 %v483_v52, %v477_v22  ;;  %v486_v25 = vadd.f32 %v484_v49, %v478_v41  ;;  %v492_v7 = vmul.f32 %v1346_v29, %v322_v14 }
  0x83   : > { %v493_v60 = vadd.f32 %v491_v18, %v485_v37  ;;  %v494_v40 = vadd.f32 %v492_v7, %v486_v25 }
  0x8a   : > { %v783_v53 = vpop.eup %782 }
  0x8b   : > { %v785_v57 = vpop.eup %784  ;;  %v497_v38 = vmul.f32 %v783_v53, %v489_v51 }
  0x8c   : > { %v498_v12 = vmul.f32 %v785_v57, %v490_v32 }
  0x8d   : > { %v499_v3 = vsub.f32 2.0, %v497_v38 }
  0x8e   : > { %v500_v43 = vsub.f32 2.0, %v498_v12 }
  0x8f   : > { %v501_v10 = vmul.f32 %v783_v53, %v499_v3 }
  0x90   : > { %v502_v58 = vmul.f32 %v785_v57, %v500_v43 }
  0x91   : > { %v503_v19 = vmul.f32 %v501_v10, %v493_v60 }
  0x92   : > { %v504_v56 = vmul.f32 %v502_v58, %v494_v40 }
  0x93   : > { %505 = vst [vmem:[%s152_s29] sm:$0xff] %v503_v19 }
  0x94   : > { %506 = vst [vmem:[%s152_s29 + $0x8] sm:$0xff] %v504_v56 }
  0x95   : > { %829 = shalt.err (!%p826_p5)
}
  0x96   : > { %s830_s22 = scalar_lea.hbm %s1375_s12, 256  ;;  %s834_s25 = scalar_lea.hbm %s1427_s1, 512 }
  0x97   : > { %p831_p4 = scmp.ne.s32.totalorder %s1375_s12, %s830_s22  ;;  %p835_p12 = scmp.lt.u32.totalorder %s1375_s12, %s1427_s1 }
  0x98   : > { %p836_p1 = scmp.lt.u32.totalorder %s834_s25, %s830_s22  ;;  %p838_p8 = scmp.lt.u32.totalorder %s830_s22, %s1375_s12 }
  0x99   : > { %p832_p7 = pnand %p831_p4, %p1451_p9 }
  0x9a   : > { %p837_p3 = por %p836_p1, %p835_p12 }
  0x9b   : > { %p833_p10 = pneg %p832_p7 }
  0x9c   : > { %p839_p11 = por %p838_p8, %p837_p3 }
  0x9e   : > { %p840_p0 = pnand %p839_p11, %p833_p10 }
  0xa0   : > { %843 = shalt.err (!%p840_p0)
}
  0xa1   : > { %s904_s4 = smov 128   ;;  %s905_s18 = smov 8  }
  0xa2   : > { %646 = dma.vmem_to_hbm [thread:$0]  (%p1451_p9), %s1377_s30, 256, %s1375_s12, %s508_s13, %s904_s4, %s904_s4, %s905_s18  }
  0xa3 PF: > { %s538_s27 = sand.u32 1, %s878_s6   ;;  %p1452_p6 = scmp.ne.s32.totalorder %s1440_s21, 0 }
  0xa4   : > { %p1453_p13 = scmp.ge.s32.totalorder %s898_s11, 2  ;;  %s539_s29 = scalar_lea.sflag [#allocation4], %s538_s27 }
  0xa6   : > { %p653_p2 = pnand %p1453_p13, %p1452_p6 }
  0xa8   : > { %873 = dma.done.wait (!%p653_p2), %s539_s29, 256  }
  0xa9   : > { %875 = vsyncadd (!%p653_p2), %s539_s29, 4294967040  ;;  %s17_s11 = sadd.s32 1, %s898_s11   ;;  %s1454_s6 = smov %s882_s7 }
  0xaa   : > { %p14_p5 = scmp.ge.s32.totalorder %s17_s11, 4   ;;  %s1455_s7 = smov %s886_s8 }
  0xab   : > { %s1456_s8 = smov %s972_s20  ;;  %s1457_s9 = smov %s894_s10 }
  0xac   : > { %s1458_s10 = smov %s1460_s14  ;;  %16 = sbr.rel (!%p14_p5) target bundleno = 6 (0x6), region = 71 }
  0xb3   :  { %544 = vsyncpa [#allocation3], 1 }
  0xb4   :  { %546 = vsyncpa [#allocation3 + $0x1], 1 }
  0xb5   :  { %547 = vsyncpa [#allocation4], 1 }
  0xb6   :  { %549 = vsyncpa [#allocation4 + $0x1], 1 }

</bundles_post_ra>
